<compile_context>
chip_gen: v5e
topology: v5e:2x2
jax: 0.10.0
libtpu: 0.0.40
codegen_flags: <defaults>
</compile_context>

<pallas_src>
import functools

import jax
import jax.numpy as jnp
from jax import lax
from jax.experimental import pallas as pl
from jax.experimental.pallas import tpu as pltpu


_MIB = 1 << 20
# One batch's (C, N) slab must be <= this to take the fused single-pass path.
# Double-buffered in + out ~= 4x slab -> <= ~24 MiB, under the 32 MiB scoped
# limit requested below on every generation (v7x physical VMEM is 64 MiB/TC).
_FUSED_SLAB_LIMIT = 6 * _MIB
# Streaming-block byte budget for the multi-pass fallback. ~4 MiB/block
# amortizes the ~0.35 us grid-step overhead against v7x's 3.2 TB/s HBM while
# Pass-3's working set (2x in + 2x out ~= 16 MiB) stays under the 32 MiB limit.
_BLOCK_BYTES = 4 * _MIB
_VMEM_LIMIT = 32 * _MIB


def _cdiv(a, b):
    return -(-a // b)


def _round_up(x, m):
    return ((x + m - 1) // m) * m


# ----------------------------------------------------------------------------
# Kernels
# ----------------------------------------------------------------------------
def _fused_crb_kernel(x_ref, w1t_ref, b1_ref, w2t_ref, b2_ref, o_ref, *, inv_n):
    """One batch slab per grid step: mean -> fc1 -> relu -> fc2 -> sigmoid -> scale."""
    x = x_ref[...]                                                    # (1, C, N)
    m = jnp.sum(x.astype(jnp.float32), axis=2) * inv_n                # (1, C)
    h = jnp.maximum(
        jnp.dot(m, w1t_ref[...], preferred_element_type=jnp.float32) + b1_ref[...],
        0.0)                                                          # (1, Cr)
    z = jnp.dot(h, w2t_ref[...], preferred_element_type=jnp.float32) + b2_ref[...]
    s = jax.nn.sigmoid(z).astype(x.dtype)                             # (1, C)
    # Native-dtype multiply (no f32 upcast of the streamed slab).
    o_ref[...] = (x * s[:, :, None]).astype(o_ref.dtype)


def _row_mean_kernel(x_ref, m_ref, *, inv_n, n_total, tn, mask_last):
    """Streaming per-row mean over the point axis of the flattened (B*C, N) view.

    x_ref: (TR, TN) input tile.  m_ref: (TR, 1) output block, resident across
    the (last, "arbitrary") reduction axis -> acts as the f32 accumulator.
    """
    n = pl.program_id(1)

    @pl.when(n == 0)
    def _init():
        m_ref[...] = jnp.zeros_like(m_ref)

    x = x_ref[...].astype(jnp.float32)
    if mask_last:  # static flag: only emitted when N % TN != 0
        col = lax.broadcasted_iota(jnp.int32, x.shape, 1) + n * tn
        x = jnp.where(col < n_total, x, 0.0)
    m_ref[...] += jnp.sum(x, axis=1, keepdims=True)

    @pl.when(n == pl.num_programs(1) - 1)
    def _finalize():
        m_ref[...] = m_ref[...] * inv_n


def _scale_kernel(x_ref, s_ref, o_ref):
    """Streaming broadcast-scale o = x * s in the native dtype (s is (TR, 1))."""
    o_ref[...] = (x_ref[...] * s_ref[...]).astype(o_ref.dtype)


# ----------------------------------------------------------------------------
# Wrapper
# ----------------------------------------------------------------------------
def point_crb(points, w1, b1, w2, b2, *, force_multipass=False):
    """PointCRB forward.  points: (B, C, N); nn.Linear-shaped params. -> (B, C, N)."""
    B, C, N = points.shape
    Cr = w1.shape[0]
    dt = points.dtype
    itemsize = jnp.dtype(dt).itemsize

    # Pre-transpose / up-cast the tiny FC params once in the wrapper.
    w1t = w1.T.astype(jnp.float32)                  # (C, Cr)
    w2t = w2.T.astype(jnp.float32)                  # (Cr, C)
    b1r = b1.reshape(1, Cr).astype(jnp.float32)
    b2r = b2.reshape(1, C).astype(jnp.float32)

    slab_bytes = C * N * itemsize

    # ---------------- Fused single-pass path (preferred) ----------------
    if slab_bytes <= _FUSED_SLAB_LIMIT and not force_multipass:
        return pl.pallas_call(
            functools.partial(_fused_crb_kernel, inv_n=1.0 / N),
            out_shape=jax.ShapeDtypeStruct((B, C, N), dt),
            grid_spec=pltpu.PrefetchScalarGridSpec(
                num_scalar_prefetch=0,
                grid=(B,),
                in_specs=[
                    pl.BlockSpec((1, C, N), lambda b: (b, 0, 0)),   # x slab
                    pl.BlockSpec((C, Cr), lambda b: (0, 0)),        # fc1 weight^T
                    pl.BlockSpec((1, Cr), lambda b: (0, 0)),        # fc1 bias
                    pl.BlockSpec((Cr, C), lambda b: (0, 0)),        # fc2 weight^T
                    pl.BlockSpec((1, C), lambda b: (0, 0)),         # fc2 bias
                ],
                out_specs=pl.BlockSpec((1, C, N), lambda b: (b, 0, 0)),
            ),
            compiler_params=pltpu.CompilerParams(
                dimension_semantics=("parallel",),      # shards batches on v7x
                vmem_limit_bytes=_VMEM_LIMIT),
        )(points, w1t, b1r, w2t, b2r)

    # ---------------- Multi-pass fallback (per-batch slab too big) ----------------
    R = B * C
    x2 = points.reshape(R, N)   # rows pack the sublane axis densely even for small C

    TR = _round_up(min(R, 256), 8)
    if R > 8 and _cdiv(R, TR) < 2:
        # Guarantee >=2 row blocks so the "parallel" axis can shard across
        # the two TensorCores on v7x.
        TR = max(8, _round_up(_cdiv(R, 2), 8))
    lane_budget = max(128, (_BLOCK_BYTES // (TR * itemsize)) // 128 * 128)
    TN = min(_round_up(N, 128), lane_budget)

    grid_r = _cdiv(R, TR)
    grid_n = _cdiv(N, TN)
    mask_last = (N % TN) != 0   # ragged last N-tile handled by in-kernel masking

    # Pass 1: per-(batch, channel) mean over the point axis (reduction axis last).
    m2 = pl.pallas_call(
        functools.partial(_row_mean_kernel, inv_n=1.0 / N, n_total=N,
                          tn=TN, mask_last=mask_last),
        out_shape=jax.ShapeDtypeStruct((R, 1), jnp.float32),
        grid_spec=pltpu.PrefetchScalarGridSpec(
            num_scalar_prefetch=0,
            grid=(grid_r, grid_n),
            in_specs=[pl.BlockSpec((TR, TN), lambda r, n: (r, n))],
            out_specs=pl.BlockSpec((TR, 1), lambda r, n: (r, 0)),
        ),
        compiler_params=pltpu.CompilerParams(
            dimension_semantics=("parallel", "arbitrary"),
            vmem_limit_bytes=_VMEM_LIMIT),
    )(x2)

    # Pass 2 (plain XLA in the wrapper): the FC chain is far below MXU
    # granularity, so a dedicated kernel launch is pure overhead.
    m = m2.reshape(B, C)
    h = jnp.maximum(m @ w1t + b1r, 0.0)
    s = jax.nn.sigmoid(h @ w2t + b2r).astype(dt)        # (B, C), native dtype
    s2 = s.reshape(R, 1)

    # Pass 3: streaming broadcast-scale, both axes parallel.
    o2 = pl.pallas_call(
        _scale_kernel,
        out_shape=jax.ShapeDtypeStruct((R, N), dt),
        grid_spec=pltpu.PrefetchScalarGridSpec(
            num_scalar_prefetch=0,
            grid=(grid_r, grid_n),
            in_specs=[
                pl.BlockSpec((TR, TN), lambda r, n: (r, n)),   # points tile
                pl.BlockSpec((TR, 1), lambda r, n: (r, 0)),    # per-row scale
            ],
            out_specs=pl.BlockSpec((TR, TN), lambda r, n: (r, n)),
        ),
        compiler_params=pltpu.CompilerParams(
            dimension_semantics=("parallel", "parallel"),
            vmem_limit_bytes=_VMEM_LIMIT),
    )(x2, s2)

    return o2.reshape(B, C, N)


# ----------------------------------------------------------------------------
# Pure-JAX reference (mirrors the PyTorch forward)
# ----------------------------------------------------------------------------
def point_crb_ref(points, w1, b1, w2, b2):
    m = jnp.mean(points, axis=2)                  # (B, C)
    h = jnp.maximum(m @ w1.T + b1, 0.0)           # (B, Cr)
    s = jax.nn.sigmoid(h @ w2.T + b2)             # (B, C)
    return points * s[:, :, None]


if __name__ == "__main__":
    key = jax.random.PRNGKey(0)
    k_x1, k_x2, k_w1, k_b1, k_w2, k_b2 = jax.random.split(key, 6)

    # Config consistent with the module: in_channel = 4, r = 2 -> reduced = 2.
    C, r = 4, 2
    Cr = C // r
    w1 = jax.random.normal(k_w1, (Cr, C), dtype=jnp.float32) * 0.1   # fc1.weight
    b1 = jax.random.normal(k_b1, (Cr,), dtype=jnp.float32) * 0.1     # fc1.bias
    w2 = jax.random.normal(k_w2, (C, Cr), dtype=jnp.float32) * 0.1   # fc2.weight
    b2 = jax.random.normal(k_b2, (C,), dtype=jnp.float32) * 0.1      # fc2.bias

    # --- Test 1: fused single-pass path (small slab). ---
    B, N = 2, 16
    pts = jax.random.normal(k_x1, (B, C, N), dtype=jnp.float32)
    out = jax.block_until_ready(point_crb(pts, w1, b1, w2, b2))
    ref = point_crb_ref(pts, w1, b1, w2, b2)
    assert out.shape == (B, C, N)
    assert jnp.allclose(out, ref, atol=1e-5, rtol=1e-5), "fused path mismatch"

    # --- Test 2: multi-pass fallback (ragged N, ragged row count, masking). ---
    B2, N2 = 3, 300
    pts2 = jax.random.normal(k_x2, (B2, C, N2), dtype=jnp.float32)
    out2 = jax.block_until_ready(
        point_crb(pts2, w1, b1, w2, b2, force_multipass=True))
    ref2 = point_crb_ref(pts2, w1, b1, w2, b2)
    assert out2.shape == (B2, C, N2)
    assert jnp.allclose(out2, ref2, atol=1e-5, rtol=1e-5), "multipass mismatch"

    print("KERNEL_OK")
</pallas_src>

<mosaic_0001>
module attributes {stable_mosaic.version = 11 : i64} {
  func.func @_fused_crb_kernel(%arg0: i32, %arg1: memref<1x4x16xf32, #tpu.memory_space<vmem>>, %arg2: memref<4x2xf32, #tpu.memory_space<vmem>>, %arg3: memref<1x2xf32, #tpu.memory_space<vmem>>, %arg4: memref<2x4xf32, #tpu.memory_space<vmem>>, %arg5: memref<1x4xf32, #tpu.memory_space<vmem>>, %arg6: memref<1x4x16xf32, #tpu.memory_space<vmem>>) attributes {dimension_semantics = [#tpu.dimension_semantics<parallel>], iteration_bounds = array<i64: 2>, scalar_prefetch = 0 : i64, scratch_operands = 0 : i64, tpu.core_type = #tpu.core_type<tc>, window_params = [{transform_indices = @transform_0, window_bounds = array<i64: 1, 4, 16>}, {pipeline_mode = #tpu.pipeline_mode<synchronous>, transform_indices = @transform_1, window_bounds = array<i64: 4, 2>}, {pipeline_mode = #tpu.pipeline_mode<synchronous>, transform_indices = @transform_2, window_bounds = array<i64: 1, 2>}, {pipeline_mode = #tpu.pipeline_mode<synchronous>, transform_indices = @transform_3, window_bounds = array<i64: 2, 4>}, {pipeline_mode = #tpu.pipeline_mode<synchronous>, transform_indices = @transform_4, window_bounds = array<i64: 1, 4>}, {transform_indices = @transform_5, window_bounds = array<i64: 1, 4, 16>}]} {
    %c0 = arith.constant 0 : index
    %c0_0 = arith.constant 0 : index
    %c0_1 = arith.constant 0 : index
    %0 = vector.load %arg1[%c0, %c0_0, %c0_1] : memref<1x4x16xf32, #tpu.memory_space<vmem>>, vector<1x4x16xf32>
    %cst = arith.constant dense<0.000000e+00> : vector<1x4xf32>
    %1 = vector.multi_reduction <add>, %0, %cst [2] : vector<1x4x16xf32> to vector<1x4xf32>
    %cst_2 = arith.constant 6.250000e-02 : f32
    %2 = vector.broadcast %cst_2 : f32 to vector<1x4xf32>
    %3 = arith.mulf %1, %2 : vector<1x4xf32>
    %c0_3 = arith.constant 0 : index
    %c0_4 = arith.constant 0 : index
    %4 = vector.load %arg2[%c0_3, %c0_4] : memref<4x2xf32, #tpu.memory_space<vmem>>, vector<4x2xf32>
    %cst_5 = arith.constant dense<0.000000e+00> : vector<1x2xf32>
    %5 = tpu.matmul %3, %4, %cst_5 {dimension_numbers = #tpu.dot_dimension_numbers<[1], [0], [0], [1], [0, 0, 1, 1], [], []>} : vector<1x4xf32>, vector<4x2xf32>, vector<1x2xf32> -> vector<1x2xf32>
    %c0_6 = arith.constant 0 : index
    %c0_7 = arith.constant 0 : index
    %6 = vector.load %arg3[%c0_6, %c0_7] : memref<1x2xf32, #tpu.memory_space<vmem>>, vector<1x2xf32>
    %7 = arith.addf %5, %6 : vector<1x2xf32>
    %cst_8 = arith.constant 0.000000e+00 : f32
    %8 = vector.broadcast %cst_8 : f32 to vector<1x2xf32>
    %9 = arith.maximumf %7, %8 : vector<1x2xf32>
    %c0_9 = arith.constant 0 : index
    %c0_10 = arith.constant 0 : index
    %10 = vector.load %arg4[%c0_9, %c0_10] : memref<2x4xf32, #tpu.memory_space<vmem>>, vector<2x4xf32>
    %cst_11 = arith.constant dense<0.000000e+00> : vector<1x4xf32>
    %11 = tpu.matmul %9, %10, %cst_11 {dimension_numbers = #tpu.dot_dimension_numbers<[1], [0], [0], [1], [0, 0, 1, 1], [], []>} : vector<1x2xf32>, vector<2x4xf32>, vector<1x4xf32> -> vector<1x4xf32>
    %c0_12 = arith.constant 0 : index
    %c0_13 = arith.constant 0 : index
    %12 = vector.load %arg5[%c0_12, %c0_13] : memref<1x4xf32, #tpu.memory_space<vmem>>, vector<1x4xf32>
    %13 = arith.addf %11, %12 : vector<1x4xf32>
    %14 = arith.negf %13 : vector<1x4xf32>
    %15 = math.exp %14 : vector<1x4xf32>
    %cst_14 = arith.constant 1.000000e+00 : f32
    %16 = vector.broadcast %cst_14 : f32 to vector<1x4xf32>
    %17 = arith.addf %16, %15 : vector<1x4xf32>
    %18 = arith.divf %16, %17 : vector<1x4xf32>
    %19 = vector.shape_cast %18 : vector<1x4xf32> to vector<1x4x1xf32>
    %20 = vector.broadcast %19 : vector<1x4x1xf32> to vector<1x4x16xf32>
    %21 = arith.mulf %0, %20 : vector<1x4x16xf32>
    %c0_15 = arith.constant 0 : index
    %c0_16 = arith.constant 0 : index
    %c0_17 = arith.constant 0 : index
    %22 = vector.load %arg6[%c0_15, %c0_16, %c0_17] : memref<1x4x16xf32, #tpu.memory_space<vmem>>, vector<1x4x16xf32>
    tpu.vector_store %arg6[%c0_15, %c0_16, %c0_17], %21 {strides = array<i32>} : memref<1x4x16xf32, #tpu.memory_space<vmem>>, vector<1x4x16xf32>,
    return
  }
  func.func @transform_0(%arg0: i32) -> (i32, i32, i32) {
    %c0_i32 = arith.constant 0 : i32
    %c0_i32_0 = arith.constant 0 : i32
    %c0_i32_1 = arith.constant 0 : i32
    return %arg0, %c0_i32, %c0_i32_0 : i32, i32, i32
  }
  func.func @transform_1(%arg0: i32) -> (i32, i32) {
    %c0_i32 = arith.constant 0 : i32
    %c0_i32_0 = arith.constant 0 : i32
    %c0_i32_1 = arith.constant 0 : i32
    return %c0_i32, %c0_i32_0 : i32, i32
  }
  func.func @transform_2(%arg0: i32) -> (i32, i32) {
    %c0_i32 = arith.constant 0 : i32
    %c0_i32_0 = arith.constant 0 : i32
    %c0_i32_1 = arith.constant 0 : i32
    return %c0_i32, %c0_i32_0 : i32, i32
  }
  func.func @transform_3(%arg0: i32) -> (i32, i32) {
    %c0_i32 = arith.constant 0 : i32
    %c0_i32_0 = arith.constant 0 : i32
    %c0_i32_1 = arith.constant 0 : i32
    return %c0_i32, %c0_i32_0 : i32, i32
  }
  func.func @transform_4(%arg0: i32) -> (i32, i32) {
    %c0_i32 = arith.constant 0 : i32
    %c0_i32_0 = arith.constant 0 : i32
    %c0_i32_1 = arith.constant 0 : i32
    return %c0_i32, %c0_i32_0 : i32, i32
  }
  func.func @transform_5(%arg0: i32) -> (i32, i32, i32) {
    %c0_i32 = arith.constant 0 : i32
    %c0_i32_0 = arith.constant 0 : i32
    %c0_i32_1 = arith.constant 0 : i32
    return %arg0, %c0_i32, %c0_i32_0 : i32, i32, i32
  }
}

</mosaic_0001>

<bundles_post_ra>
// kernel: tpu_custom_call.1
= control target key start
LH: loop header
LB: loop body
LE: loop exit
PB: predicated region body
PF: predicated region fallthrough
CT: control target
= control target key end

     0   :  { %10 = vsyncpa [#allocation3], 0  ;;  %s767_s0 = inlined_call_operand.hbm [shape: f32[2,4,16], index: 0, kind: input, shape index: {}]   ;;  %s768_s1 = inlined_call_operand.vmem [shape: f32[4,2], index: 1, kind: input, shape index: {}]   ;;  %s769_s2 = inlined_call_operand.vmem [shape: f32[1,2], index: 2, kind: input, shape index: {}]   ;;  %s770_s3 = inlined_call_operand.vmem [shape: f32[2,4], index: 3, kind: input, shape index: {}]   ;;  %s771_s4 = inlined_call_operand.vmem [shape: f32[1,4], index: 4, kind: input, shape index: {}]   ;;  %s772_s5 = inlined_call_operand.hbm [shape: f32[2,4,16], index: 5, kind: output, shape index: {}]  }
   0x1   :  { %12 = vsyncpa [#allocation3 + $0x1], 0 }
   0x2   :  { %13 = vsyncpa [#allocation4], 0 }
   0x3   :  { %15 = vsyncpa [#allocation4 + $0x1], 0  ;;  %s622_s18 = smov 0   ;;  %s624_s19 = smov 0  }
   0x4   :  { %s626_s20 = smov 0   ;;  %s628_s21 = smov 0  }
   0x5 LB: > { %s643_s22 = sadd.s32 4294967295, %s590_s21   ;;  %s426_s23 = sadd.s32 4294967294, %s590_s21   ;;  %s590_s21 = sphi %s628_s21, %s782_s21   ;;  %s586_s20 = sphi %s626_s20, %s781_s20   ;;  %s582_s19 = sphi %s624_s19, %s780_s19   ;;  %s578_s18 = sphi %s622_s18, %s779_s18  }
   0x6   : > { %s647_s24 = sadd.s32 1, %s590_s21   ;;  %s28_s25 = sadd.s32 1, %s586_s20 }
   0x7   : > { %s25_s26 = ssub.s32 %s590_s21, %s647_s24  ;;  %p35_p0 = scmp.ne.s32.totalorder %s586_s20, %s582_s19 }
   0x8   : > { %p26_p1 = scmp.eq.s32.totalorder %s25_s26, 0  ;;  %p36_p2 = scmp.eq.s32.totalorder %s590_s21, 0 }
   0x9   : > { %p41_p3 = scmp.ne.s32.totalorder %s582_s19, %s578_s18  ;;  %p42_p4 = scmp.eq.s32.totalorder %s643_s22, 0 }
   0xa   : > { %s659_s27 = scalar_select %p26_p1, %s586_s20, %s28_s25  }
   0xb   : > { %p661_p5 = por %p36_p2, %p35_p0  ;;  %p665_p6 = por %p42_p4, %p41_p3 }
   0xc   : > { %p149_p7 = scmp.eq.s32.totalorder %s643_s22, 1  ;;  %p155_p8 = scmp.eq.s32.totalorder %s426_s23, 1 }
   0xd   : > { %p455_p10 = scmp.lt.s32.totalorder %s590_s21, 2  ;;  %s187_s7 = sand.u32 1, %s586_s20  }
   0xe   : > { %p672_p11 = por %p149_p7, %p35_p0  ;;  %p676_p12 = por %p155_p8, %p41_p3 }
   0xf   : > { %s430_s8 = sshll.u32 %s590_s21, 2  ;;  %s429_s9 = sshll.u32 %s187_s7, 2 }
  0x10   : > { %s195_s12 = scalar_lea.hbm %s767_s0, %s430_s8  ;;  %s191_s14 = scalar_lea.vmem [#allocation2], %s429_s9 }
  0x11   : > { %s197_s13 = sshll.u32 %s195_s12, 4  ;;  %s199_s15 = sshll.u32 %s191_s14, 4  ;;  %s198_s13 = int_to_ptr.hbm [resolvable:$true] %s197_s13  ;;  %s200_s15 = int_to_ptr.vmem [resolvable:$true] %s199_s15 }
  0x12   : > { %p687_p13 = pnand %p455_p10, %p661_p5  ;;  %p431_p0 = scmp.ge.s32.totalorder %s590_s21, 1 }
  0x13   : > { %p204_p1 = scmp.lt.s32.totalorder %s590_s21, 3  ;;  %s188_s17 = scalar_lea.sflag [#allocation3], %s187_s7 }
  0x14   : > { %s494_s23 = sshra.s32 %s198_s13, 4  ;;  %p498_p3 = pneg %p687_p13  ;;  %s495_s23 = int_to_ptr.hbm [resolvable:$true] %s494_s23 }
  0x15   : > { %s496_s25 = scalar_lea.hbm %s495_s23, 4  ;;  %s501_s28 = scalar_lea.hbm %s767_s0, 8 }
  0x16   : > { %p497_p2 = scmp.ne.s32.totalorder %s495_s23, %s496_s25  ;;  %p502_p5 = scmp.lt.s32.totalorder %s495_s23, %s767_s0 }
  0x17   : > { %p503_p8 = scmp.lt.s32.totalorder %s501_s28, %s496_s25 }
  0x18   : > { %p499_p4 = pnand %p498_p3, %p497_p2 }
  0x19   : > { %p504_p10 = por %p503_p8, %p502_p5 }
  0x1a   : > { %p500_p7 = pneg %p499_p4 }
  0x1c   : > { %p505_p9 = pnand %p504_p10, %p500_p7 }
  0x1e   : > { %508 = shalt.err (!%p505_p9)
}
  0x1f   : > { %450 = dma.hbm_to_vmem [thread:$0]  (!%p687_p13), %s198_s13, 64, %s200_s15, %s188_s17  }
  0x20   : > { %p205_p2 = pnand %p431_p0, %p204_p1 }
  0x21   : > { %s708_s7 = sand.u32 (!%p205_p2), 1, %s582_s19  }
  0x22   : > { %208 = sbr.rel (%p205_p2) target bundleno = 570 (0x23a), region = 40  ;;  %s432_s11 = sshll.u32 (!%p205_p2), %s708_s7, 2 }
  0x23   : > { %s211_s12 = scalar_lea.sflag (!%p205_p2), [#allocation3], %s708_s7  ;;  %s214_s14 = scalar_lea.vmem (!%p205_p2), [#allocation2], %s432_s11 }
  0x27   : > { %569 = dma.done.wait (%p665_p6), %s211_s12, 64  }
  0x28   : > { %571 = vsyncadd (%p665_p6), %s211_s12, 4294967232  ;;  %vm243_vm0 = vcmask 125952   ;;  %v242_v0 = vld [vmem:[%s214_s14] sm:$0xf]  ;;  %vm257_vm1 = vcmask 1043456   ;;  %v251_v3 = vlaneseq  ;;  %vm254_vm2 = vcmask 31744  }
  0x29   : > { %v244_v1 = vsel %vm243_vm0, %v242_v0, 0.0  ;;  %v248_v2 = vld [vmem:[%s768_s1] sm:$0xf]  ;;  %vm288_vm3 = vcmask 1041408   ;;  %vm284_vm4 = vcmask 15360   ;;  %s440_s8 = sshll.u32 %s643_s22, 2 }
  0x2a   : > { %245 = vadd.xlane.f32.xlu0 %v244_v1  ;;  %434 = vmatpush.msk.msra.mxu0 %vm257_vm1, %v248_v2  ;;  %v252_v4 = vand.u32 127, %v251_v3  ;;  %v282_v8 = vld [vmem:[%s770_s3] sm:$0x3]  ;;  %v333_v13 = vshrl.u32 %v251_v3, 7  ;;  %s351_s10 = scalar_lea.hbm %s772_s5, %s440_s8  ;;  %s241_s12 = scalar_lea.vmem [#allocation5], %s432_s11 }
  0x2b   : > { %436 = vmatpush.msk.msra.mxu1 %vm288_vm3, %v282_v8  ;;  %v249_v9 = vld [vmem:[%s769_s2] sm:$0x1]  ;;  %s353_s14 = sshll.u32 %s241_s12, 4  ;;  %s355_s13 = sshll.u32 %s351_s10, 4  ;;  %s354_s14 = int_to_ptr.vmem [resolvable:$true] %s353_s14  ;;  %s356_s13 = int_to_ptr.hbm [resolvable:$true] %s355_s13 }
  0x2c   : > { %489 = vset.pattern.permute.xlu0 %v333_v13  ;;  %v283_v14 = vld [vmem:[%s771_s4] sm:$0x1]  ;;  %s341_s15 = scalar_lea.sflag [#allocation4], %s708_s7  ;;  %s538_s29 = sshra.s32 %s356_s13, 4  ;;  %s539_s29 = int_to_ptr.hbm [resolvable:$true] %s538_s29 }
  0x2d   : > { %s540_s16 = scalar_lea.hbm %s539_s29, 4  ;;  %s544_s11 = scalar_lea.hbm %s772_s5, 8 }
  0x2e   : > { %p541_p6 = scmp.ne.s32.totalorder %s539_s29, %s540_s16  ;;  %p545_p0 = scmp.lt.s32.totalorder %s539_s29, %s772_s5 }
  0x2f   : > { %p546_p1 = scmp.lt.s32.totalorder %s544_s11, %s540_s16 }
  0x30   : > { %p542_p9 = pnand %p541_p6, %p672_p11 }
  0x31   : > { %p547_p3 = por %p546_p1, %p545_p0 }
  0x32   : > { %p543_p13 = pneg %p542_p9 }
  0x34   : > { %p548_p4 = pnand %p547_p3, %p543_p13 }
  0x9d   : > { %v246_v5 = vpop.xlane.xlu0 %245 }
  0x9e   : > { %v247_v6 = vmul.f32 0.0625, %v246_v5 }
  0xa0   : > { %v253_v7 = vperm.slane %v247_v6, %v252_v4 }
  0xa2   : > { %435 = vmatmul.msk.f32.vlgmr.msra.gmra.mxu0 %vm254_vm2, %v253_v7 }
 0x11f   : > { %v278_v10 = vpop.f32.mrf.mxu0 }
 0x120   : > { %v279_v11 = vadd.f32 %v278_v10, %v249_v9 }
 0x122   : > { %v281_v12 = vmax.f32 %v279_v11, 0.0 }
 0x124   : > { %437 = vmatmul.msk.f32.vlgmr.msra.gmra.mxu1 %vm284_vm4, %v281_v12 }
 0x1a1   : > { %v309_v15 = vpop.f32.mrf.mxu1 }
 0x1a2   : > { %v310_v16 = vadd.f32 %v309_v15, %v283_v14 }
 0x1a4   : > { %v438_v17 = vmul.f32 -1.442695, %v310_v16 }
 0x1a6   : > { %490 = vpow2.f32 %v438_v17 }
 0x1ac   : > { %v491_v18 = vpop.eup %490 }
 0x1ad   : > { %v315_v19 = vadd.f32 1.0, %v491_v18 }
 0x1af   : > { %492 = vrcp.f32 %v315_v19  ;;  %v327_v23 = vand.u32 2147483648, %v315_v19  ;;  %v325_v25 = vand.u32 2147483647, %v315_v19  ;;  %vm321_vm6 = vweird.f32 %v315_v19 }
 0x1b1   : > { %v328_v27 = vor.u32 1.1754944e-38, %v327_v23  ;;  %vm326_vm8 = vcmp.eq.f32.partialorder %v325_v25, 8.507059e+37 }
 0x1b5   : > { %v493_v20 = vpop.eup %492 }
 0x1b6   : > { %v317_v21 = vmul.f32 %v493_v20, %v315_v19  ;;  %vm322_vm5 = vweird.f32 %v493_v20 }
 0x1b7   : > { %vm323_vm7 = vmor %vm321_vm6, %vm322_vm5 }
 0x1b8   : > { %v318_v22 = vsub.f32 1.0, %v317_v21 }
 0x1ba   : > { %v319_v24 = vmul.f32 %v493_v20, %v318_v22 }
 0x1bc   : > { %v320_v26 = vadd.f32 %v493_v20, %v319_v24 }
 0x1be   : > { %v324_v28 = vsel %vm323_vm7, %v493_v20, %v320_v26 }
 0x1bf   : > { %v329_v29 = vsel %vm326_vm8, %v328_v27, %v324_v28 }
 0x1c0   : > { %v331_v30 = vperm.slane %v329_v29, 0 }
 0x1c2   : > { %336 = vperm.xlu0 %489, %v331_v30  }
 0x234   : > { %v337_v31 = vpop.permute.xlu0 %336 }
 0x235   : > { %v338_v32 = vmul.f32 %v337_v31, %v242_v0 }
 0x237   : > { %339 = vst.msk [vmem:[%s241_s12] sm:$0xf] %vm243_vm0, %v338_v32 }
 0x238   : > { %551 = shalt.err (!%p548_p4)
}
 0x239   : > { %445 = dma.vmem_to_hbm [thread:$0]  (%p672_p11), %s354_s14, 64, %s356_s13, %s341_s15  }
 0x23a PF: > { %s367_s7 = sand.u32 1, %s578_s18   ;;  %p778_p7 = scmp.ge.s32.totalorder %s590_s21, 2 }
 0x23b   : > { %s368_s26 = scalar_lea.sflag [#allocation4], %s367_s7 }
 0x23c   : > { %p452_p5 = pnand %p778_p7, %p676_p12 }
 0x23e   : > { %p453_p8 = pneg %p452_p5 }
 0x240   : > { %573 = dma.done.wait (%p453_p8), %s368_s26, 64  }
 0x241   : > { %575 = vsyncadd (%p453_p8), %s368_s26, 4294967232  ;;  %p18_p10 = scmp.ge.s32.totalorder %s647_s24, 4   ;;  %s779_s18 = smov %s582_s19 }
 0x242   : > { %s780_s19 = smov %s586_s20  ;;  %s781_s20 = smov %s659_s27 }
 0x243   : > { %s782_s21 = smov %s647_s24  ;;  %20 = sbr.rel (!%p18_p10) target bundleno = 5 (0x5), region = 85 }
 0x248   :  { %374 = vsyncpa [#allocation3], 1 }
 0x249   :  { %376 = vsyncpa [#allocation3 + $0x1], 1 }
 0x24a   :  { %377 = vsyncpa [#allocation4], 1 }
 0x24b   :  { %379 = vsyncpa [#allocation4 + $0x1], 1 }

</bundles_post_ra>
